<compile_context>
chip_gen: v6e
topology: v6e:2x2x1
jax: 0.10.0
libtpu: 0.0.40
codegen_flags: <defaults>
</compile_context>

<pallas_src>
import functools
import math

import jax
import jax.numpy as jnp
from jax.experimental import pallas as pl
from jax.experimental.pallas import tpu as pltpu


# ---------------------------------------------------------------------------
# Helpers
# ---------------------------------------------------------------------------

def _vmem_limit_bytes():
    """Chip-aware VMEM budget: physical capacity minus ~16 MiB headroom
    (v7x: 64->48 MiB; v5e/v6e: 128->112 MiB). Falls back to 48 MiB."""
    default_cap = 64 * 1024 * 1024
    try:
        info = pltpu.get_tpu_info()
        cap = int(getattr(info, "vmem_capacity_bytes", default_cap))
    except Exception:
        cap = default_cap
    return int(min(max(cap - 16 * 1024 * 1024, 32 * 1024 * 1024), 112 * 1024 * 1024))


def _row_tile(M, target=512):
    """Largest row tile (multiple of 8, divides M) up to `target`; else full M."""
    if M <= target or M % 8 != 0:
        return M
    best = 8
    for rb in range(8, target + 1, 8):
        if M % rb == 0:
            best = rb
    return best


def _ffn_chunk(I, target=1024):
    """Chunk width for tiling the FFN intermediate dim (caps the live f32
    activation); keeps both FFN matmuls MXU-shaped (K/N >= 128)."""
    if I <= target:
        return I
    best = I
    for c in range(128, target + 1, 128):
        if I % c == 0:
            best = c
    return best


# ---------------------------------------------------------------------------
# Kernel 1: embedding LayerNorm fused with the E -> H mapping matmul (bf16 out)
# ---------------------------------------------------------------------------

def _emb_ln_map_kernel(e_ref, g_ref, b_ref, w_ref, mb_ref, o_ref, *, eps):
    e = e_ref[...]                                            # (rb, E) f32
    mu = jnp.mean(e, axis=-1, keepdims=True)
    var = jnp.mean((e - mu) ** 2, axis=-1, keepdims=True)
    n = (e - mu) * jax.lax.rsqrt(var + eps) * g_ref[...] + b_ref[...]
    y = jnp.dot(n.astype(jnp.bfloat16), w_ref[...],
                preferred_element_type=jnp.float32) + mb_ref[...]
    o_ref[...] = y.astype(o_ref.dtype)                        # bf16 kernel boundary


def embed_ln_map(emb, gamma, beta, map_w_bf16, map_b, eps=1e-12):
    M, E = emb.shape
    H = map_w_bf16.shape[1]
    rb = _row_tile(M)
    return pl.pallas_call(
        functools.partial(_emb_ln_map_kernel, eps=eps),
        out_shape=jax.ShapeDtypeStruct((M, H), jnp.bfloat16),
        grid=(M // rb,),
        in_specs=[
            pl.BlockSpec((rb, E), lambda i: (i, 0)),
            pl.BlockSpec((1, E), lambda i: (0, 0)),
            pl.BlockSpec((1, E), lambda i: (0, 0)),
            pl.BlockSpec((E, H), lambda i: (0, 0)),
            pl.BlockSpec((1, H), lambda i: (0, 0)),
        ],
        out_specs=pl.BlockSpec((rb, H), lambda i: (i, 0)),
        compiler_params=pltpu.CompilerParams(dimension_semantics=("parallel",)),
    )(emb, gamma, beta, map_w_bf16, map_b)


# ---------------------------------------------------------------------------
# Kernel 2: one full ALBERT layer (attention + FFN), layer loop as inner grid axis
# ---------------------------------------------------------------------------

def _albert_layer_kernel(x_ref, mask_ref,
                         wqkv_ref, bqkv_ref, wo_ref, bo_ref,
                         g1_ref, be1_ref,
                         w1_ref, b1_ref, w2_ref, b2_ref,
                         g2_ref, be2_ref,
                         h_ref,
                         *, bt, seq, nh, hd, eps, ffn_chunk):
    H = nh * hd
    rows = bt * seq

    # Layer 0: seed the VMEM-resident hidden-state block from the mapped embeddings.
    @pl.when(pl.program_id(1) == 0)
    def _():
        h_ref[...] = x_ref[...]

    h_bf = h_ref[...]                          # (rows, H) bf16, resident across layers
    h_f32 = h_bf.astype(jnp.float32)
    mask = mask_ref[...]                       # (bt, 1, seq) additive f32

    # --- fused QKV projection: one full-width (H, 3H) MXU matmul.
    # The 1/sqrt(hd) attention scale is folded into the Q weights/bias at prep time.
    qkv = (jnp.dot(h_bf, wqkv_ref[...], preferred_element_type=jnp.float32)
           + bqkv_ref[...])                    # (rows, 3H) f32

    # --- attention (scores / softmax / context) per head; q/k/v are static column
    # slices of the single fused qkv buffer, and the per-head contexts are merged on
    # the feature axis so the output projection below is ONE full-depth (K=H) matmul.
    ctx_heads = []
    for hh in range(nh):
        q = qkv[:, hh * hd:(hh + 1) * hd].reshape(bt, seq, hd)
        k = qkv[:, H + hh * hd:H + (hh + 1) * hd].reshape(bt, seq, hd)
        v = qkv[:, 2 * H + hh * hd:2 * H + (hh + 1) * hd].reshape(bt, seq, hd)
        s = jnp.einsum('bqd,bkd->bqk', q.astype(jnp.bfloat16), k.astype(jnp.bfloat16),
                       preferred_element_type=jnp.float32) + mask
        s = s - jnp.max(s, axis=-1, keepdims=True)
        p = jnp.exp(s)
        p = p * pl.reciprocal(jnp.sum(p, axis=-1, keepdims=True), approx=True)
        ctx = jnp.einsum('bqk,bkd->bqd', p.astype(jnp.bfloat16), v.astype(jnp.bfloat16),
                         preferred_element_type=jnp.float32)
        ctx_heads.append(ctx.reshape(rows, hd))
    merged = jnp.concatenate(ctx_heads, axis=-1)          # merge_heads -> (rows, H)

    # --- output projection (single K=H matmul) + residual + LayerNorm (f32 stats) ---
    h1 = (jnp.dot(merged.astype(jnp.bfloat16), wo_ref[...],
                  preferred_element_type=jnp.float32) + bo_ref[...] + h_f32)
    mu = jnp.mean(h1, axis=-1, keepdims=True)
    var = jnp.mean((h1 - mu) ** 2, axis=-1, keepdims=True)
    h1 = (h1 - mu) * jax.lax.rsqrt(var + eps) * g1_ref[...] + be1_ref[...]
    h1b = h1.astype(jnp.bfloat16)

    # --- FFN: gelu_new(h1 @ W1 + b1) @ W2 + b2, tiled over the intermediate dim so
    # the live f32 (rows, I) activation never materializes in full. ---
    I = w1_ref.shape[1]
    h2 = jnp.zeros((rows, H), jnp.float32)
    for c0 in range(0, I, ffn_chunk):
        f = (jnp.dot(h1b, w1_ref[:, c0:c0 + ffn_chunk],
                     preferred_element_type=jnp.float32) + b1_ref[:, c0:c0 + ffn_chunk])
        f = jax.nn.gelu(f, approximate=True)               # ALBERT gelu_new
        h2 = h2 + jnp.dot(f.astype(jnp.bfloat16), w2_ref[c0:c0 + ffn_chunk, :],
                          preferred_element_type=jnp.float32)
    h2 = h2 + b2_ref[...] + h1
    mu2 = jnp.mean(h2, axis=-1, keepdims=True)
    var2 = jnp.mean((h2 - mu2) ** 2, axis=-1, keepdims=True)
    out = (h2 - mu2) * jax.lax.rsqrt(var2 + eps) * g2_ref[...] + be2_ref[...]
    h_ref[...] = out.astype(h_ref.dtype)                    # bf16 residual stream


def albert_layers(x, mask_add, w, *, num_layers, num_heads, batch, seq, bt=1,
                  eps=1e-12, single_buffer_weights=True, alias_hidden=True):
    M, H = x.shape
    hd = H // num_heads
    assert batch % bt == 0 and M == batch * seq
    rows = bt * seq
    grid = (batch // bt, num_layers)   # batch: parallel (megacore); layers: sequential
    ffn_chunk = _ffn_chunk(w["w1"].shape[1])

    # Constant-index weights: single-buffer them (no point double-buffering blocks
    # whose index_map never changes — halves resident weight VMEM, critical on v7x).
    wkw = {"pipeline_mode": pl.Buffered(1)} if single_buffer_weights else {}

    def wspec(arr):
        return pl.BlockSpec(arr.shape, lambda b, l: (0,) * arr.ndim, **wkw)

    weights = (w["wqkv"], w["bqkv"], w["wo"], w["bo"], w["ln1_g"], w["ln1_b"],
               w["w1"], w["b1"], w["w2"], w["b2"], w["ln2_g"], w["ln2_b"])

    kern = functools.partial(_albert_layer_kernel, bt=bt, seq=seq, nh=num_heads,
                             hd=hd, eps=eps, ffn_chunk=ffn_chunk)
    extra = {"input_output_aliases": {0: 0}} if alias_hidden else {}

    return pl.pallas_call(
        kern,
        out_shape=jax.ShapeDtypeStruct((M, H), x.dtype),
        grid=grid,
        in_specs=[pl.BlockSpec((rows, H), lambda b, l: (b, 0)),        # mapped embeddings
                  pl.BlockSpec((bt, 1, seq), lambda b, l: (b, 0, 0))]  # additive mask
                 + [wspec(a) for a in weights],
        out_specs=pl.BlockSpec((rows, H), lambda b, l: (b, 0)),        # resident across layers
        compiler_params=pltpu.CompilerParams(
            dimension_semantics=("parallel", "arbitrary"),
            vmem_limit_bytes=_vmem_limit_bytes()),
        **extra,
    )(x, mask_add, *weights)


# ---------------------------------------------------------------------------
# Kernel 3: pooler (tanh on CLS) + dropout(eval: identity) + classifier, fused
# ---------------------------------------------------------------------------

def _pool_cls_kernel(x_ref, pw_ref, pb_ref, cw_ref, cb_ref, o_ref):
    pooled = jnp.tanh(jnp.dot(x_ref[...].astype(jnp.bfloat16), pw_ref[...],
                              preferred_element_type=jnp.float32) + pb_ref[...])
    # dropout (p=0.2) is identity in eval mode
    o_ref[...] = (jnp.dot(pooled.astype(jnp.bfloat16), cw_ref[...],
                          preferred_element_type=jnp.float32) + cb_ref[...])


def pool_and_classify(cls_tok, pool_w, pool_b, cls_w_pad, cls_b_pad):
    B, H = cls_tok.shape
    NPAD = cls_w_pad.shape[1]
    return pl.pallas_call(
        _pool_cls_kernel,
        out_shape=jax.ShapeDtypeStruct((B, NPAD), jnp.float32),
        grid=(1,),
        in_specs=[
            pl.BlockSpec((B, H), lambda i: (0, 0)),
            pl.BlockSpec((H, H), lambda i: (0, 0)),
            pl.BlockSpec((1, H), lambda i: (0, 0)),
            pl.BlockSpec((H, NPAD), lambda i: (0, 0)),
            pl.BlockSpec((1, NPAD), lambda i: (0, 0)),
        ],
        out_specs=pl.BlockSpec((B, NPAD), lambda i: (0, 0)),
        compiler_params=pltpu.CompilerParams(dimension_semantics=("arbitrary",)),
    )(cls_tok, pool_w, pool_b, cls_w_pad, cls_b_pad)


# ---------------------------------------------------------------------------
# Parameter init (deterministic, synthetic — mirrors an ALBERT encoder + head)
# ---------------------------------------------------------------------------

def init_params(key, *, vocab, max_pos, type_vocab, E, H, I, num_labels):
    keys = jax.random.split(key, 32)
    ki = iter(keys)

    def w(shape, scale=0.02):
        return jax.random.normal(next(ki), shape, jnp.float32) * scale

    def z(shape):
        return jnp.zeros(shape, jnp.float32)

    def o(shape):
        return jnp.ones(shape, jnp.float32)

    return {
        "word_emb": w((vocab, E)),
        "pos_emb": w((max_pos, E)),
        "tok_emb": w((type_vocab, E)),
        "emb_ln_g": o((E,)), "emb_ln_b": z((E,)),
        "map_w": w((E, H)), "map_b": z((H,)),
        # ALBERT shares one layer's parameters across all layers
        "wq": w((H, H)), "bq": z((H,)),
        "wk": w((H, H)), "bk": z((H,)),
        "wv": w((H, H)), "bv": z((H,)),
        "wo": w((H, H)), "bo": z((H,)),
        "attn_ln_g": o((H,)), "attn_ln_b": z((H,)),
        "w1": w((H, I)), "b1": z((I,)),
        "w2": w((I, H)), "b2": z((H,)),
        "ffn_ln_g": o((H,)), "ffn_ln_b": z((H,)),
        "pool_w": w((H, H)), "pool_b": z((H,)),
        "cls_w": w((H, num_labels)), "cls_b": z((num_labels,)),
    }


def prepare_weights(params, num_heads, lane_pad=128):
    """One-time re-layout: bf16 matmul weights; fused (H, 3H) QKV operand with the
    1/sqrt(hd) scale folded into Q; plain (H, H) output projection (head-major input
    features); f32 biases/LN params as (1, N); classifier padded to 128 lanes."""
    H = params["map_w"].shape[1]
    E = params["map_w"].shape[0]
    I = params["w1"].shape[1]
    nl = params["cls_w"].shape[1]
    hd = H // num_heads
    scale = 1.0 / math.sqrt(hd)
    bf = jnp.bfloat16

    wqkv = jnp.concatenate(
        [params["wq"] * scale, params["wk"], params["wv"]], axis=1).astype(bf)
    bqkv = jnp.concatenate(
        [params["bq"] * scale, params["bk"], params["bv"]], axis=0).reshape(1, 3 * H)

    npad = max(lane_pad, nl)
    cls_w_pad = jnp.zeros((H, npad), jnp.float32).at[:, :nl].set(params["cls_w"]).astype(bf)
    cls_b_pad = jnp.zeros((1, npad), jnp.float32).at[:, :nl].set(params["cls_b"][None, :])

    return {
        "emb_ln_g": params["emb_ln_g"].reshape(1, E),
        "emb_ln_b": params["emb_ln_b"].reshape(1, E),
        "map_w": params["map_w"].astype(bf),
        "map_b": params["map_b"].reshape(1, H),
        "wqkv": wqkv, "bqkv": bqkv,
        "wo": params["wo"].astype(bf), "bo": params["bo"].reshape(1, H),
        "ln1_g": params["attn_ln_g"].reshape(1, H),
        "ln1_b": params["attn_ln_b"].reshape(1, H),
        "w1": params["w1"].astype(bf), "b1": params["b1"].reshape(1, I),
        "w2": params["w2"].astype(bf), "b2": params["b2"].reshape(1, H),
        "ln2_g": params["ffn_ln_g"].reshape(1, H),
        "ln2_b": params["ffn_ln_b"].reshape(1, H),
        "pool_w": params["pool_w"].astype(bf),
        "pool_b": params["pool_b"].reshape(1, H),
        "cls_w_pad": cls_w_pad, "cls_b_pad": cls_b_pad,
    }


# ---------------------------------------------------------------------------
# Forward pass (AlbertFineTuneModel.forward, eval mode)
# ---------------------------------------------------------------------------

def albert_finetune_forward(params, input_ids, token_type_ids, attention_mask,
                            *, num_heads, num_layers, num_labels):
    B, S = input_ids.shape
    H = params["map_w"].shape[1]

    w = prepare_weights(params, num_heads)

    # --- embeddings (table gathers: glue in plain JAX) ---
    emb = (params["word_emb"][input_ids]
           + params["pos_emb"][:S][None, :, :]
           + params["tok_emb"][token_type_ids]).reshape(B * S, -1)

    # fused embedding LayerNorm + E->H mapping (bf16 kernel boundary)
    h = embed_ln_map(emb, w["emb_ln_g"], w["emb_ln_b"], w["map_w"], w["map_b"])

    # additive attention mask per batch element; broadcast over heads inside kernel
    mask_add = (1.0 - attention_mask.astype(jnp.float32))[:, None, :] * -1e9  # (B,1,S)

    # Keep >=2 batch grid steps when possible (v7x 2-TC sharding), pack sequences
    # per step (bt>1) when the batch is large enough to raise matmul M on v5e/v6e.
    bt = 2 if (B % 2 == 0 and B >= 4) else 1
    kwargs = dict(num_layers=num_layers, num_heads=num_heads, batch=B, seq=S, bt=bt)
    try:
        h = albert_layers(h, mask_add, w, single_buffer_weights=True,
                          alias_hidden=True, **kwargs)
    except Exception:
        # Conservative fallback for jax versions without Buffered(1) / aliasing support.
        h = albert_layers(h, mask_add, w, single_buffer_weights=False,
                          alias_hidden=False, **kwargs)

    # pooler on CLS token + dropout(eval identity) + classifier (fused, lane-padded)
    cls_tok = h.reshape(B, S, H)[:, 0, :]
    logits_pad = pool_and_classify(cls_tok, w["pool_w"], w["pool_b"],
                                   w["cls_w_pad"], w["cls_b_pad"])
    logits = logits_pad[:, :num_labels]

    # TODO(synk): training-mode CrossEntropyLoss / accuracy not implemented (eval path returns 0.0)
    loss, accuracy = 0.0, 0.0
    return logits, loss, accuracy


# ---------------------------------------------------------------------------
# Main
# ---------------------------------------------------------------------------

if __name__ == "__main__":
    B, S = 2, 16
    VOCAB, MAX_POS, TYPE_VOCAB = 50, 16, 2
    E, H, I = 16, 32, 64
    NUM_HEADS, NUM_LAYERS = 2, 2
    NUM_LABELS = 3

    key = jax.random.PRNGKey(0)
    k_param, k_ids = jax.random.split(key)

    params = init_params(k_param, vocab=VOCAB, max_pos=MAX_POS,
                         type_vocab=TYPE_VOCAB, E=E, H=H, I=I,
                         num_labels=NUM_LABELS)

    input_ids = jax.random.randint(k_ids, (B, S), 0, VOCAB, dtype=jnp.int32)
    token_type_ids = jnp.zeros((B, S), dtype=jnp.int32)
    attention_mask = jnp.array(
        [[1] * 16,
         [1] * 12 + [0] * 4], dtype=jnp.int32)

    logits, loss, acc = albert_finetune_forward(
        params, input_ids, token_type_ids, attention_mask,
        num_heads=NUM_HEADS, num_layers=NUM_LAYERS, num_labels=NUM_LABELS)
    logits = jax.block_until_ready(logits)

    assert logits.shape == (B, NUM_LABELS)
    assert logits.dtype == jnp.float32
    assert bool(jnp.all(jnp.isfinite(logits)))
    print("KERNEL_OK")
</pallas_src>

<mosaic_0001>
module attributes {stable_mosaic.version = 11 : i64} {
  func.func @_emb_ln_map_kernel(%arg0: i32, %arg1: memref<32x16xf32, #tpu.memory_space<vmem>>, %arg2: memref<1x16xf32, #tpu.memory_space<vmem>>, %arg3: memref<1x16xf32, #tpu.memory_space<vmem>>, %arg4: memref<16x32xbf16, #tpu.memory_space<vmem>>, %arg5: memref<1x32xf32, #tpu.memory_space<vmem>>, %arg6: memref<32x32xbf16, #tpu.memory_space<vmem>>) attributes {dimension_semantics = [#tpu.dimension_semantics<parallel>], iteration_bounds = array<i64: 1>, scalar_prefetch = 0 : i64, scratch_operands = 0 : i64, tpu.core_type = #tpu.core_type<tc>, window_params = [{transform_indices = @transform_0, window_bounds = array<i64: 32, 16>}, {pipeline_mode = #tpu.pipeline_mode<synchronous>, transform_indices = @transform_1, window_bounds = array<i64: 1, 16>}, {pipeline_mode = #tpu.pipeline_mode<synchronous>, transform_indices = @transform_2, window_bounds = array<i64: 1, 16>}, {pipeline_mode = #tpu.pipeline_mode<synchronous>, transform_indices = @transform_3, window_bounds = array<i64: 16, 32>}, {pipeline_mode = #tpu.pipeline_mode<synchronous>, transform_indices = @transform_4, window_bounds = array<i64: 1, 32>}, {transform_indices = @transform_5, window_bounds = array<i64: 32, 32>}]} {
    %c0 = arith.constant 0 : index
    %c0_0 = arith.constant 0 : index
    %0 = vector.load %arg1[%c0, %c0_0] : memref<32x16xf32, #tpu.memory_space<vmem>>, vector<32x16xf32>
    %cst = arith.constant dense<0.000000e+00> : vector<32xf32>
    %1 = vector.multi_reduction <add>, %0, %cst [1] : vector<32x16xf32> to vector<32xf32>
    %2 = vector.shape_cast %1 : vector<32xf32> to vector<32x1xf32>
    %cst_1 = arith.constant 1.600000e+01 : f32
    %3 = vector.broadcast %cst_1 : f32 to vector<32x1xf32>
    %4 = arith.divf %2, %3 : vector<32x1xf32>
    %5 = vector.broadcast %4 : vector<32x1xf32> to vector<32x16xf32>
    %6 = arith.subf %0, %5 : vector<32x16xf32>
    %7 = arith.mulf %6, %6 : vector<32x16xf32>
    %cst_2 = arith.constant dense<0.000000e+00> : vector<32xf32>
    %8 = vector.multi_reduction <add>, %7, %cst_2 [1] : vector<32x16xf32> to vector<32xf32>
    %9 = vector.shape_cast %8 : vector<32xf32> to vector<32x1xf32>
    %cst_3 = arith.constant 1.600000e+01 : f32
    %10 = vector.broadcast %cst_3 : f32 to vector<32x1xf32>
    %11 = arith.divf %9, %10 : vector<32x1xf32>
    %12 = vector.broadcast %4 : vector<32x1xf32> to vector<32x16xf32>
    %13 = arith.subf %0, %12 : vector<32x16xf32>
    %cst_4 = arith.constant 9.99999996E-13 : f32
    %14 = vector.broadcast %cst_4 : f32 to vector<32x1xf32>
    %15 = arith.addf %11, %14 : vector<32x1xf32>
    %16 = math.rsqrt %15 : vector<32x1xf32>
    %17 = vector.broadcast %16 : vector<32x1xf32> to vector<32x16xf32>
    %18 = arith.mulf %13, %17 : vector<32x16xf32>
    %c0_5 = arith.constant 0 : index
    %c0_6 = arith.constant 0 : index
    %19 = vector.load %arg2[%c0_5, %c0_6] : memref<1x16xf32, #tpu.memory_space<vmem>>, vector<1x16xf32>
    %20 = vector.broadcast %19 : vector<1x16xf32> to vector<32x16xf32>
    %21 = arith.mulf %18, %20 : vector<32x16xf32>
    %c0_7 = arith.constant 0 : index
    %c0_8 = arith.constant 0 : index
    %22 = vector.load %arg3[%c0_7, %c0_8] : memref<1x16xf32, #tpu.memory_space<vmem>>, vector<1x16xf32>
    %23 = vector.broadcast %22 : vector<1x16xf32> to vector<32x16xf32>
    %24 = arith.addf %21, %23 : vector<32x16xf32>
    %25 = arith.truncf %24 : vector<32x16xf32> to vector<32x16xbf16>
    %c0_9 = arith.constant 0 : index
    %c0_10 = arith.constant 0 : index
    %26 = vector.load %arg4[%c0_9, %c0_10] : memref<16x32xbf16, #tpu.memory_space<vmem>>, vector<16x32xbf16>
    %cst_11 = arith.constant dense<0.000000e+00> : vector<32x32xf32>
    %27 = tpu.matmul %25, %26, %cst_11 {dimension_numbers = #tpu.dot_dimension_numbers<[1], [0], [0], [1], [0, 0, 1, 1], [], []>} : vector<32x16xbf16>, vector<16x32xbf16>, vector<32x32xf32> -> vector<32x32xf32>
    %c0_12 = arith.constant 0 : index
    %c0_13 = arith.constant 0 : index
    %28 = vector.load %arg5[%c0_12, %c0_13] : memref<1x32xf32, #tpu.memory_space<vmem>>, vector<1x32xf32>
    %29 = vector.broadcast %28 : vector<1x32xf32> to vector<32x32xf32>
    %30 = arith.addf %27, %29 : vector<32x32xf32>
    %31 = arith.truncf %30 : vector<32x32xf32> to vector<32x32xbf16>
    %c0_14 = arith.constant 0 : index
    %c0_15 = arith.constant 0 : index
    %32 = vector.load %arg6[%c0_14, %c0_15] : memref<32x32xbf16, #tpu.memory_space<vmem>>, vector<32x32xbf16>
    tpu.vector_store %arg6[%c0_14, %c0_15], %31 {strides = array<i32>} : memref<32x32xbf16, #tpu.memory_space<vmem>>, vector<32x32xbf16>,
    return
  }
  func.func @transform_0(%arg0: i32) -> (i32, i32) {
    %c0_i32 = arith.constant 0 : i32
    %c0_i32_0 = arith.constant 0 : i32
    return %arg0, %c0_i32 : i32, i32
  }
  func.func @transform_1(%arg0: i32) -> (i32, i32) {
    %c0_i32 = arith.constant 0 : i32
    %c0_i32_0 = arith.constant 0 : i32
    %c0_i32_1 = arith.constant 0 : i32
    return %c0_i32, %c0_i32_0 : i32, i32
  }
  func.func @transform_2(%arg0: i32) -> (i32, i32) {
    %c0_i32 = arith.constant 0 : i32
    %c0_i32_0 = arith.constant 0 : i32
    %c0_i32_1 = arith.constant 0 : i32
    return %c0_i32, %c0_i32_0 : i32, i32
  }
  func.func @transform_3(%arg0: i32) -> (i32, i32) {
    %c0_i32 = arith.constant 0 : i32
    %c0_i32_0 = arith.constant 0 : i32
    %c0_i32_1 = arith.constant 0 : i32
    return %c0_i32, %c0_i32_0 : i32, i32
  }
  func.func @transform_4(%arg0: i32) -> (i32, i32) {
    %c0_i32 = arith.constant 0 : i32
    %c0_i32_0 = arith.constant 0 : i32
    %c0_i32_1 = arith.constant 0 : i32
    return %c0_i32, %c0_i32_0 : i32, i32
  }
  func.func @transform_5(%arg0: i32) -> (i32, i32) {
    %c0_i32 = arith.constant 0 : i32
    %c0_i32_0 = arith.constant 0 : i32
    return %arg0, %c0_i32 : i32, i32
  }
}

</mosaic_0001>

<bundles_post_ra>
// kernel: tpu_custom_call.1
= control target key start
LH: loop header
LB: loop body
LE: loop exit
PB: predicated region body
PF: predicated region fallthrough
CT: control target
= control target key end

     0   :  { %vm26_vm0 = vcmask 130048   ;;  %s342_s0 = inlined_call_operand.vmem [shape: f32[32,16], index: 0, kind: input, shape index: {}]   ;;  %s343_s1 = inlined_call_operand.vmem [shape: f32[1,16], index: 1, kind: input, shape index: {}]   ;;  %s344_s2 = inlined_call_operand.vmem [shape: f32[1,16], index: 2, kind: input, shape index: {}]   ;;  %s345_s3 = inlined_call_operand.vmem [shape: bf16[16,32], index: 3, kind: input, shape index: {}]   ;;  %s346_s4 = inlined_call_operand.vmem [shape: f32[1,32], index: 4, kind: input, shape index: {}]   ;;  %s347_s5 = inlined_call_operand.hbm [shape: bf16[32,32], index: 5, kind: output, shape index: {}]  }
   0x1   :  { %v22_v0 = vld [vmem:[%s342_s0] sm:$0xff]  ;;  %v24_v1 = vld [vmem:[%s342_s0 + $0x10] sm:$0xff]  ;;  %v23_v2 = vld [vmem:[%s342_s0 + $0x8] sm:$0xff] }
   0x2   :  { %v27_v3 = vsel %vm26_vm0, %v22_v0, 0.0  ;;  %v33_v4 = vsel %vm26_vm0, %v24_v1, 0.0  ;;  %v25_v5 = vld [vmem:[%s342_s0 + $0x18] sm:$0xff] }
   0x3   :  { %28 = vadd.xlane.f32.xlu0 %v27_v3  ;;  %34 = vadd.xlane.f32.xlu1 %v33_v4 }
   0x4   :  { %10 = vsyncpa [#allocation3], 0  ;;  %v30_v6 = vsel %vm26_vm0, %v23_v2, 0.0  ;;  %v36_v7 = vsel %vm26_vm0, %v25_v5, 0.0  ;;  %v237_v28 = vld [vmem:[%s345_s3] sm:$0xff]   ;;  %vm190_vm1 = vcmask 257024  }
   0x5   :  { %228 = vmatprep.subr.bf16.mxu0 %v237_v28  ;;  %v211_v43 = vld [vmem:[%s343_s1] ss:$0 sm:$0xff] }
   0x6   :  { %229 = vmatpush3.bf16.msra.mxu0 %v237_v28  ;;  %v212_v48 = vld [vmem:[%s344_s2] ss:$0 sm:$0xff]  ;;  %s268_s2 = smov [#allocation2]  }
   0x7   :  { %31 = vadd.xlane.f32.xlu0 %v30_v6  ;;  %37 = vadd.xlane.f32.xlu1 %v36_v7  ;;  %v213_v61 = vld [vmem:[%s346_s4] ss:$0 sm:$0xff]  ;;  %s200_s6 = sshll.u32 %s268_s2, 4  ;;  %s201_s6 = int_to_ptr.vmem [resolvable:$true] %s200_s6 }
   0x8   :  { %s246_s4 = scalar_lea.vmem %s201_s6, 256  ;;  %p251_p1 = scmp.lt.s32.totalorder %s201_s6, %s201_s6 }
   0x9   :  { %p247_p0 = scmp.ne.s32.totalorder %s201_s6, %s246_s4  ;;  %p252_p2 = scmp.lt.s32.totalorder %s246_s4, %s246_s4 }
   0xb   :  { %p253_p3 = por %p252_p2, %p251_p1 }
   0xd   :  { %p254_p4 = pnand %p253_p3, %p247_p0 }
  0x8c   :  { %v29_v8 = vpop.xlane.xlu0 %28  ;;  %v35_v9 = vpop.xlane.xlu1 %34 }
  0x8d   :  { %v40_v10 = vmul.f32 0.0625, %v29_v8  ;;  %v42_v11 = vmul.f32 0.0625, %v35_v9 }
  0x8f   :  { %v44_v12 = vsub.f32 %v22_v0, %v40_v10  ;;  %v46_v13 = vsub.f32 %v24_v1, %v42_v11 }
  0x90   :  { %v32_v14 = vpop.xlane.xlu0 %31  ;;  %v38_v15 = vpop.xlane.xlu1 %37 }
  0x91   :  { %v41_v16 = vmul.f32 0.0625, %v32_v14  ;;  %v43_v17 = vmul.f32 0.0625, %v38_v15  ;;  %v48_v18 = vmul.f32 %v44_v12, %v44_v12  ;;  %v50_v19 = vmul.f32 %v46_v13, %v46_v13 }
  0x93   :  { %v45_v20 = vsub.f32 %v23_v2, %v41_v16  ;;  %v47_v21 = vsub.f32 %v25_v5, %v43_v17  ;;  %v52_v22 = vsel %vm26_vm0, %v48_v18, 0.0  ;;  %v58_v23 = vsel %vm26_vm0, %v50_v19, 0.0 }
  0x94   :  { %53 = vadd.xlane.f32.xlu0 %v52_v22 }
  0x95   :  { %v49_v24 = vmul.f32 %v45_v20, %v45_v20  ;;  %v51_v25 = vmul.f32 %v47_v21, %v47_v21 }
  0x97   :  { %v55_v26 = vsel %vm26_vm0, %v49_v24, 0.0  ;;  %v61_v27 = vsel %vm26_vm0, %v51_v25, 0.0 }
  0x98   :  { %59 = vadd.xlane.f32.xlu0 %v58_v23  ;;  %56 = vadd.xlane.f32.xlu1 %v55_v26 }
  0x9c   :  { %62 = vadd.xlane.f32.xlu1 %v61_v27 }
 0x11d   :  { %v54_v29 = vpop.xlane.xlu0 %53 }
 0x11e   :  { %v64_v30 = vmul.f32 0.0625, %v54_v29 }
 0x120   :  { %v68_v31 = vadd.f32 1e-12, %v64_v30 }
 0x121   :  { %v57_v32 = vpop.xlane.xlu1 %56  ;;  %v60_v33 = vpop.xlane.xlu0 %59 }
 0x122   :  { %238 = vrsqrt.f32 %v68_v31  ;;  %v65_v34 = vmul.f32 0.0625, %v57_v32  ;;  %v66_v35 = vmul.f32 0.0625, %v60_v33 }
 0x124   :  { %v69_v36 = vadd.f32 1e-12, %v65_v34  ;;  %v70_v37 = vadd.f32 1e-12, %v66_v35 }
 0x125   :  { %v63_v38 = vpop.xlane.xlu1 %62 }
 0x126   :  { %240 = vrsqrt.f32 %v69_v36  ;;  %v67_v39 = vmul.f32 0.0625, %v63_v38 }
 0x127   :  { %242 = vrsqrt.f32 %v70_v37 }
 0x128   :  { %v71_v40 = vadd.f32 1e-12, %v67_v39 }
 0x12a   :  { %244 = vrsqrt.f32 %v71_v40 }
 0x12f   :  { %v239_v41 = vpop.eup %238 }
 0x130   :  { %v76_v42 = vmul.f32 %v239_v41, %v44_v12 }
 0x132   :  { %v87_v47 = vmul.f32 %v211_v43, %v76_v42 }
 0x133   :  { %v241_v44 = vpop.eup %240 }
 0x134   :  { %v243_v45 = vpop.eup %242  ;;  %v77_v46 = vmul.f32 %v241_v44, %v45_v20  ;;  %v98_v52 = vadd.f32 %v212_v48, %v87_v47 }
 0x135   :  { %v78_v49 = vmul.f32 %v243_v45, %v46_v13 }
 0x136   :  { %v88_v50 = vmul.f32 %v211_v43, %v77_v46 }
 0x137   :  { %v245_v51 = vpop.eup %244  ;;  %v89_v55 = vmul.f32 %v211_v43, %v78_v49 }
 0x138   :  { %v99_v53 = vadd.f32 %v212_v48, %v88_v50  ;;  %v79_v54 = vmul.f32 %v245_v51, %v47_v21 }
 0x139   :  { %v100_v58 = vadd.f32 %v212_v48, %v89_v55 }
 0x13a   :  { %v102_v56 = vpack.c.bf16 %v99_v53, %v98_v52  ;;  %v90_v57 = vmul.f32 %v211_v43, %v79_v54 }
 0x13c   :  { %230 = vmatprep.mubr.msk.bf16.mxu0 %vm26_vm0, %v102_v56  ;;  %v101_v59 = vadd.f32 %v212_v48, %v90_v57 }
 0x13e   :  { %v103_v60 = vpack.c.bf16 %v101_v59, %v100_v58 }
 0x140   :  { %231 = vmatmul.mubr.msk.bf16.vlgmr.msra.gmra.mxu0 %vm26_vm0, %v103_v60 }
 0x200   :  { %v232_v62 = vpop.f32.mrf.mxu0 }
 0x201   :  { %v168_v63 = vadd.f32 %v232_v62, %v213_v61 }
 0x202   :  { %v159_v0 = vpop.f32.mrf.mxu0 }
 0x203   :  { %v223_v1 = vpack.c.bf16 %v168_v63, %v168_v63  ;;  %v160_v2 = vadd.f32 %v213_v61, %v159_v0 }
 0x204   :  { %v233_v3 = vpop.f32.mrf.mxu0 }
 0x205   :  { %193 = vst.msk [vmem:[#allocation2 + $0x8] sm:$0xf] %vm190_vm1, %v223_v1  ;;  %v221_v4 = vpack.c.bf16 %v160_v2, %v160_v2  ;;  %v171_v5 = vadd.f32 %v233_v3, %v213_v61 }
 0x206   :  { %v162_v6 = vpop.f32.mrf.mxu0 }
 0x207   :  { %191 = vst.msk [vmem:[#allocation2] sm:$0xf] %vm190_vm1, %v221_v4  ;;  %v224_v7 = vpack.c.bf16 %v171_v5, %v171_v5  ;;  %v163_v8 = vadd.f32 %v213_v61, %v162_v6 }
 0x209   :  { %194 = vst.msk [vmem:[#allocation2 + $0xc] sm:$0xf] %vm190_vm1, %v224_v7  ;;  %v222_v9 = vpack.c.bf16 %v163_v8, %v163_v8 }
 0x20b   :  { %192 = vst.msk [vmem:[#allocation2 + $0x4] sm:$0xf] %vm190_vm1, %v222_v9 }
 0x20c   :  { %257 = shalt.err (!%p254_p4)
}
 0x20d   :  { %s269_s7 = smov 64   ;;  %s270_s8 = smov 4  }
 0x20e   :  { %206 = dma.vmem_to_hbm [thread:$0]  %s201_s6, 256, %s347_s5, [#allocation3], %s269_s7, %s269_s7, %s270_s8  }
 0x20f   :  { %266 = dma.done.wait [#allocation3], 256  }
 0x210   :  { %267 = vsyncadd [#allocation3], 4294967040 }
 0x211   :  { %210 = vsyncpa [#allocation3], 1 }

</bundles_post_ra>
